<compile_context>
chip_gen: v7x
topology: tpu7x:2x2x1
jax: 0.10.0
libtpu: 0.0.40
codegen_flags: <defaults>
</compile_context>

<pallas_src>
import functools

import jax
import jax.numpy as jnp
from jax.experimental import pallas as pl
from jax.experimental.pallas import tpu as pltpu

NEG_SLOPE = 0.01  # PyTorch leaky_relu default


def _leaky_relu(x):
    return jnp.where(x >= 0, x, NEG_SLOPE * x)


def _softplus(x):
    # matches torch.nn.functional.softplus(beta=1, threshold=20)
    return jnp.where(x > 20.0, x, jnp.log1p(jnp.exp(jnp.minimum(x, 20.0))))


def gnn_actor_kernel(x_ref, s_ref, w_in_ref, b_in_ref, w_tag_ref, b_tag_ref,
                     w_out_ref, b_out_ref, out_ref, *, n_taps, n_layers,
                     action_ndim):
    K = n_taps
    s = s_ref[...]  # bf16 [N, N], loaded once, reused by every layer/tap

    # read-in: single plain Linear (bf16 operands, f32 accumulation)
    h = jnp.dot(x_ref[...], w_in_ref[...],
                preferred_element_type=jnp.float32) + b_in_ref[...]

    for l in range(n_layers):
        # Tap 0 projects h directly — no z-scratch copy, no masked lane stores.
        acc = jnp.dot(h.astype(jnp.bfloat16), w_tag_ref[l, 0],
                      preferred_element_type=jnp.float32)
        z = h
        for k in range(1, K + 1):
            # Serial in-kernel tap recurrence: z_k = S @ z_{k-1}.
            z = jnp.dot(s, z.astype(jnp.bfloat16),
                        preferred_element_type=jnp.float32)
            acc = acc + jnp.dot(z.astype(jnp.bfloat16), w_tag_ref[l, k],
                                preferred_element_type=jnp.float32)
        h = _leaky_relu(acc + b_tag_ref[l:l + 1, :])
        # mlp_per_gnn_layers=0, dropout=0.0 -> nothing else per layer.

    # read-out to a lane-padded (multiple-of-128) slab; softplus on sigma half.
    act = jnp.dot(h.astype(jnp.bfloat16), w_out_ref[...],
                  preferred_element_type=jnp.float32) + b_out_ref[...]
    col = jax.lax.broadcasted_iota(jnp.int32, act.shape, 1)
    out_ref[...] = jnp.where(col < action_ndim, act, _softplus(act))


def build_dense_adjacency(edge_index, edge_attr, num_nodes):
    """Dense S = D^{-1/2} A D^{-1/2} (TAGConv's gcn_norm, no self loops)."""
    src, dst = edge_index[0], edge_index[1]
    w = edge_attr.astype(jnp.float32)
    deg = jnp.zeros((num_nodes,), jnp.float32).at[dst].add(w)
    dinv = jnp.where(deg > 0, jax.lax.rsqrt(deg), 0.0)
    norm = dinv[src] * w * dinv[dst]
    S = jnp.zeros((num_nodes, num_nodes), jnp.float32).at[dst, src].add(norm)
    return S


def _round_up(x, m):
    return (x + m - 1) // m * m


def _cost_estimate(N, state_ndim, C, K, L, out_pad):
    flops = 2 * N * state_ndim * C
    flops += L * (2 * K * N * N * C + 2 * (K + 1) * N * C * C)
    flops += 2 * N * C * out_pad
    transcendentals = 2 * N * out_pad  # exp + log1p
    bytes_accessed = (2 * (N * state_ndim + N * N + state_ndim * C      # bf16
                           + L * (K + 1) * C * C + C * out_pad)
                      + 4 * (C + L * C + out_pad + N * out_pad))        # f32
    return pl.CostEstimate(flops=flops, transcendentals=transcendentals,
                           bytes_accessed=bytes_accessed)


def gnn_actor_forward(state, edge_index, edge_attr, params, *, n_taps,
                      n_layers, n_channels, action_ndim):
    N, state_ndim = state.shape
    C = n_channels
    A = action_ndim
    out_pad = _round_up(max(2 * A, 128), 128)

    S = build_dense_adjacency(edge_index, edge_attr, N).astype(jnp.bfloat16)

    # bf16 MXU operands; biases stay f32 (added post-accumulation).
    x_bf = state.astype(jnp.bfloat16)
    w_in = params["w_in"].astype(jnp.bfloat16)
    w_tag = params["w_tag"].astype(jnp.bfloat16)              # [L, K+1, C, C]
    w_out = jnp.zeros((C, out_pad), jnp.bfloat16).at[:, :2 * A].set(
        params["w_out"].astype(jnp.bfloat16))
    b_out = jnp.zeros((1, out_pad), jnp.float32).at[:, :2 * A].set(
        params["b_out"])

    kernel = functools.partial(gnn_actor_kernel, n_taps=n_taps,
                               n_layers=n_layers, action_ndim=A)

    # VMEM residency (single invocation, everything resident, no pipelining).
    resident_bytes = (2 * (N * state_ndim + N * N + state_ndim * C
                           + n_layers * (n_taps + 1) * C * C + C * out_pad)
                      + 4 * (C + n_layers * C + out_pad + N * out_pad)
                      + 4 * 4 * N * C)                # h / z / acc temporaries
    vmem_limit = int(min(max(2 * resident_bytes, 16 * 1024 * 1024),
                         48 * 1024 * 1024))           # stay well under v7x 64MiB

    vmem = pl.BlockSpec(memory_space=pltpu.MemorySpace.VMEM)
    act = pl.pallas_call(
        kernel,
        out_shape=jax.ShapeDtypeStruct((N, out_pad), jnp.float32),
        in_specs=[vmem] * 8,
        out_specs=vmem,
        compiler_params=pltpu.CompilerParams(vmem_limit_bytes=vmem_limit),
        cost_estimate=_cost_estimate(N, state_ndim, C, n_taps, n_layers,
                                     out_pad),
    )(x_bf, S, w_in, params["b_in"], w_tag, params["b_tag"], w_out, b_out)

    mu = act[:, :A]
    sigma = act[:, A:2 * A]
    return mu, sigma


def gnn_actor_reference(state, edge_index, edge_attr, params, *, n_taps,
                        n_layers, n_channels, action_ndim):
    """Pure-JAX f32 reference mirroring the original (serial-tap) semantics."""
    N = state.shape[0]
    S = build_dense_adjacency(edge_index, edge_attr, N)
    h = state @ params["w_in"] + params["b_in"]
    for l in range(n_layers):
        w = params["w_tag"][l]                         # [K+1, C, C]
        out = h @ w[0]
        z = h
        for k in range(1, n_taps + 1):
            z = S @ z
            out = out + z @ w[k]
        h = _leaky_relu(out + params["b_tag"][l])
    act = h @ params["w_out"] + params["b_out"]
    return act[:, :action_ndim], _softplus(act[:, action_ndim:])


def init_params(key, state_ndim, action_ndim, n_taps, n_layers, n_channels):
    ks = jax.random.split(key, 6)

    def uniform(k, shape, fan_in):
        s = 1.0 / jnp.sqrt(jnp.float32(fan_in))
        return jax.random.uniform(k, shape, jnp.float32, -s, s)

    C, K, A = n_channels, n_taps, action_ndim
    return {
        "w_in": uniform(ks[0], (state_ndim, C), state_ndim),
        "b_in": uniform(ks[1], (1, C), state_ndim),
        # per-layer, per-tap TAG weights: [n_layers, K+1, C, C]
        "w_tag": uniform(ks[2], (n_layers, K + 1, C, C), (K + 1) * C),
        "b_tag": uniform(ks[3], (n_layers, C), (K + 1) * C),
        "w_out": uniform(ks[4], (C, 2 * A), C),
        "b_out": uniform(ks[5], (1, 2 * A), C),
    }


if __name__ == "__main__":
    # small deterministic problem
    N_NODES = 16
    STATE_NDIM = 4
    ACTION_NDIM = 2
    N_TAPS = 4
    N_LAYERS = 2
    N_CHANNELS = 32
    N_EDGES = 48

    key = jax.random.PRNGKey(0)
    k_state, k_src, k_dst, k_w = jax.random.split(key, 4)
    state = jax.random.normal(k_state, (N_NODES, STATE_NDIM), jnp.float32)
    src = jax.random.randint(k_src, (N_EDGES,), 0, N_NODES)
    dst = jax.random.randint(k_dst, (N_EDGES,), 0, N_NODES)
    edge_index = jnp.stack([src, dst])                       # [2, E]
    edge_attr = jax.random.uniform(k_w, (N_EDGES,), jnp.float32, 0.1, 1.0)

    params = init_params(jax.random.PRNGKey(1), STATE_NDIM, ACTION_NDIM,
                         N_TAPS, N_LAYERS, N_CHANNELS)

    hp = dict(n_taps=N_TAPS, n_layers=N_LAYERS,
              n_channels=N_CHANNELS, action_ndim=ACTION_NDIM)

    mu, sigma = gnn_actor_forward(state, edge_index, edge_attr, params, **hp)
    jax.block_until_ready((mu, sigma))

    mu_ref, sigma_ref = gnn_actor_reference(state, edge_index, edge_attr,
                                            params, **hp)
    assert mu.shape == (N_NODES, ACTION_NDIM)
    assert sigma.shape == (N_NODES, ACTION_NDIM)
    assert bool(jnp.all(sigma >= 0.0))
    # bf16 MXU operands in the kernel vs f32 reference -> loosened tolerance.
    assert jnp.allclose(mu, mu_ref, rtol=1e-1, atol=1e-1)
    assert jnp.allclose(sigma, sigma_ref, rtol=1e-1, atol=1e-1)

    print("KERNEL_OK")
</pallas_src>

<mosaic_0001>
module attributes {stable_mosaic.version = 11 : i64} {
  func.func @gnn_actor_kernel(%arg0: memref<16x4xbf16, #tpu.memory_space<vmem>>, %arg1: memref<16x16xbf16, #tpu.memory_space<vmem>>, %arg2: memref<4x32xbf16, #tpu.memory_space<vmem>>, %arg3: memref<1x32xf32, #tpu.memory_space<vmem>>, %arg4: memref<2x5x32x32xbf16, #tpu.memory_space<vmem>>, %arg5: memref<2x32xf32, #tpu.memory_space<vmem>>, %arg6: memref<32x128xbf16, #tpu.memory_space<vmem>>, %arg7: memref<1x128xf32, #tpu.memory_space<vmem>>, %arg8: memref<16x128xf32, #tpu.memory_space<vmem>>) attributes {dimension_semantics = [], scalar_prefetch = 0 : i64, scratch_operands = 0 : i64, tpu.core_type = #tpu.core_type<tc>} {
    %c0 = arith.constant 0 : index
    %c0_0 = arith.constant 0 : index
    %0 = vector.load %arg1[%c0, %c0_0] : memref<16x16xbf16, #tpu.memory_space<vmem>>, vector<16x16xbf16>
    %c0_1 = arith.constant 0 : index
    %c0_2 = arith.constant 0 : index
    %1 = vector.load %arg0[%c0_1, %c0_2] : memref<16x4xbf16, #tpu.memory_space<vmem>>, vector<16x4xbf16>
    %c0_3 = arith.constant 0 : index
    %c0_4 = arith.constant 0 : index
    %2 = vector.load %arg2[%c0_3, %c0_4] : memref<4x32xbf16, #tpu.memory_space<vmem>>, vector<4x32xbf16>
    %cst = arith.constant dense<0.000000e+00> : vector<16x32xf32>
    %3 = tpu.matmul %1, %2, %cst {dimension_numbers = #tpu.dot_dimension_numbers<[1], [0], [0], [1], [0, 0, 1, 1], [], []>} : vector<16x4xbf16>, vector<4x32xbf16>, vector<16x32xf32> -> vector<16x32xf32>
    %c0_5 = arith.constant 0 : index
    %c0_6 = arith.constant 0 : index
    %4 = vector.load %arg3[%c0_5, %c0_6] : memref<1x32xf32, #tpu.memory_space<vmem>>, vector<1x32xf32>
    %5 = vector.broadcast %4 : vector<1x32xf32> to vector<16x32xf32>
    %6 = arith.addf %3, %5 : vector<16x32xf32>
    %7 = arith.truncf %6 : vector<16x32xf32> to vector<16x32xbf16>
    %c0_7 = arith.constant 0 : index
    %c0_8 = arith.constant 0 : index
    %c0_9 = arith.constant 0 : index
    %c0_10 = arith.constant 0 : index
    %8 = vector.load %arg4[%c0_7, %c0_8, %c0_9, %c0_10] : memref<2x5x32x32xbf16, #tpu.memory_space<vmem>>, vector<1x1x32x32xbf16>
    %9 = vector.shape_cast %8 : vector<1x1x32x32xbf16> to vector<32x32xbf16>
    %cst_11 = arith.constant dense<0.000000e+00> : vector<16x32xf32>
    %10 = tpu.matmul %7, %9, %cst_11 {dimension_numbers = #tpu.dot_dimension_numbers<[1], [0], [0], [1], [0, 0, 1, 1], [], []>} : vector<16x32xbf16>, vector<32x32xbf16>, vector<16x32xf32> -> vector<16x32xf32>
    %11 = arith.truncf %6 : vector<16x32xf32> to vector<16x32xbf16>
    %cst_12 = arith.constant dense<0.000000e+00> : vector<16x32xf32>
    %12 = tpu.matmul %0, %11, %cst_12 {dimension_numbers = #tpu.dot_dimension_numbers<[1], [0], [0], [1], [0, 0, 1, 1], [], []>} : vector<16x16xbf16>, vector<16x32xbf16>, vector<16x32xf32> -> vector<16x32xf32>
    %13 = arith.truncf %12 : vector<16x32xf32> to vector<16x32xbf16>
    %c0_13 = arith.constant 0 : index
    %c1 = arith.constant 1 : index
    %c0_14 = arith.constant 0 : index
    %c0_15 = arith.constant 0 : index
    %14 = vector.load %arg4[%c0_13, %c1, %c0_14, %c0_15] : memref<2x5x32x32xbf16, #tpu.memory_space<vmem>>, vector<1x1x32x32xbf16>
    %15 = vector.shape_cast %14 : vector<1x1x32x32xbf16> to vector<32x32xbf16>
    %cst_16 = arith.constant dense<0.000000e+00> : vector<16x32xf32>
    %16 = tpu.matmul %13, %15, %cst_16 {dimension_numbers = #tpu.dot_dimension_numbers<[1], [0], [0], [1], [0, 0, 1, 1], [], []>} : vector<16x32xbf16>, vector<32x32xbf16>, vector<16x32xf32> -> vector<16x32xf32>
    %17 = arith.addf %10, %16 : vector<16x32xf32>
    %18 = arith.truncf %12 : vector<16x32xf32> to vector<16x32xbf16>
    %cst_17 = arith.constant dense<0.000000e+00> : vector<16x32xf32>
    %19 = tpu.matmul %0, %18, %cst_17 {dimension_numbers = #tpu.dot_dimension_numbers<[1], [0], [0], [1], [0, 0, 1, 1], [], []>} : vector<16x16xbf16>, vector<16x32xbf16>, vector<16x32xf32> -> vector<16x32xf32>
    %20 = arith.truncf %19 : vector<16x32xf32> to vector<16x32xbf16>
    %c0_18 = arith.constant 0 : index
    %c2 = arith.constant 2 : index
    %c0_19 = arith.constant 0 : index
    %c0_20 = arith.constant 0 : index
    %21 = vector.load %arg4[%c0_18, %c2, %c0_19, %c0_20] : memref<2x5x32x32xbf16, #tpu.memory_space<vmem>>, vector<1x1x32x32xbf16>
    %22 = vector.shape_cast %21 : vector<1x1x32x32xbf16> to vector<32x32xbf16>
    %cst_21 = arith.constant dense<0.000000e+00> : vector<16x32xf32>
    %23 = tpu.matmul %20, %22, %cst_21 {dimension_numbers = #tpu.dot_dimension_numbers<[1], [0], [0], [1], [0, 0, 1, 1], [], []>} : vector<16x32xbf16>, vector<32x32xbf16>, vector<16x32xf32> -> vector<16x32xf32>
    %24 = arith.addf %17, %23 : vector<16x32xf32>
    %25 = arith.truncf %19 : vector<16x32xf32> to vector<16x32xbf16>
    %cst_22 = arith.constant dense<0.000000e+00> : vector<16x32xf32>
    %26 = tpu.matmul %0, %25, %cst_22 {dimension_numbers = #tpu.dot_dimension_numbers<[1], [0], [0], [1], [0, 0, 1, 1], [], []>} : vector<16x16xbf16>, vector<16x32xbf16>, vector<16x32xf32> -> vector<16x32xf32>
    %27 = arith.truncf %26 : vector<16x32xf32> to vector<16x32xbf16>
    %c0_23 = arith.constant 0 : index
    %c3 = arith.constant 3 : index
    %c0_24 = arith.constant 0 : index
    %c0_25 = arith.constant 0 : index
    %28 = vector.load %arg4[%c0_23, %c3, %c0_24, %c0_25] : memref<2x5x32x32xbf16, #tpu.memory_space<vmem>>, vector<1x1x32x32xbf16>
    %29 = vector.shape_cast %28 : vector<1x1x32x32xbf16> to vector<32x32xbf16>
    %cst_26 = arith.constant dense<0.000000e+00> : vector<16x32xf32>
    %30 = tpu.matmul %27, %29, %cst_26 {dimension_numbers = #tpu.dot_dimension_numbers<[1], [0], [0], [1], [0, 0, 1, 1], [], []>} : vector<16x32xbf16>, vector<32x32xbf16>, vector<16x32xf32> -> vector<16x32xf32>
    %31 = arith.addf %24, %30 : vector<16x32xf32>
    %32 = arith.truncf %26 : vector<16x32xf32> to vector<16x32xbf16>
    %cst_27 = arith.constant dense<0.000000e+00> : vector<16x32xf32>
    %33 = tpu.matmul %0, %32, %cst_27 {dimension_numbers = #tpu.dot_dimension_numbers<[1], [0], [0], [1], [0, 0, 1, 1], [], []>} : vector<16x16xbf16>, vector<16x32xbf16>, vector<16x32xf32> -> vector<16x32xf32>
    %34 = arith.truncf %33 : vector<16x32xf32> to vector<16x32xbf16>
    %c0_28 = arith.constant 0 : index
    %c4 = arith.constant 4 : index
    %c0_29 = arith.constant 0 : index
    %c0_30 = arith.constant 0 : index
    %35 = vector.load %arg4[%c0_28, %c4, %c0_29, %c0_30] : memref<2x5x32x32xbf16, #tpu.memory_space<vmem>>, vector<1x1x32x32xbf16>
    %36 = vector.shape_cast %35 : vector<1x1x32x32xbf16> to vector<32x32xbf16>
    %cst_31 = arith.constant dense<0.000000e+00> : vector<16x32xf32>
    %37 = tpu.matmul %34, %36, %cst_31 {dimension_numbers = #tpu.dot_dimension_numbers<[1], [0], [0], [1], [0, 0, 1, 1], [], []>} : vector<16x32xbf16>, vector<32x32xbf16>, vector<16x32xf32> -> vector<16x32xf32>
    %38 = arith.addf %31, %37 : vector<16x32xf32>
    %c0_32 = arith.constant 0 : index
    %c0_33 = arith.constant 0 : index
    %39 = vector.load %arg5[%c0_32, %c0_33] : memref<2x32xf32, #tpu.memory_space<vmem>>, vector<1x32xf32>
    %40 = vector.broadcast %39 : vector<1x32xf32> to vector<16x32xf32>
    %41 = arith.addf %38, %40 : vector<16x32xf32>
    %cst_34 = arith.constant 0.000000e+00 : f32
    %42 = vector.broadcast %cst_34 : f32 to vector<16x32xf32>
    %43 = arith.cmpf oge, %41, %42 : vector<16x32xf32>
    %cst_35 = arith.constant 0.00999999977 : f32
    %44 = vector.broadcast %cst_35 : f32 to vector<16x32xf32>
    %45 = arith.mulf %44, %41 : vector<16x32xf32>
    %46 = arith.select %43, %41, %45 : vector<16x32xi1>, vector<16x32xf32>
    %47 = arith.truncf %46 : vector<16x32xf32> to vector<16x32xbf16>
    %c1_36 = arith.constant 1 : index
    %c0_37 = arith.constant 0 : index
    %c0_38 = arith.constant 0 : index
    %c0_39 = arith.constant 0 : index
    %48 = vector.load %arg4[%c1_36, %c0_37, %c0_38, %c0_39] : memref<2x5x32x32xbf16, #tpu.memory_space<vmem>>, vector<1x1x32x32xbf16>
    %49 = vector.shape_cast %48 : vector<1x1x32x32xbf16> to vector<32x32xbf16>
    %cst_40 = arith.constant dense<0.000000e+00> : vector<16x32xf32>
    %50 = tpu.matmul %47, %49, %cst_40 {dimension_numbers = #tpu.dot_dimension_numbers<[1], [0], [0], [1], [0, 0, 1, 1], [], []>} : vector<16x32xbf16>, vector<32x32xbf16>, vector<16x32xf32> -> vector<16x32xf32>
    %51 = arith.truncf %46 : vector<16x32xf32> to vector<16x32xbf16>
    %cst_41 = arith.constant dense<0.000000e+00> : vector<16x32xf32>
    %52 = tpu.matmul %0, %51, %cst_41 {dimension_numbers = #tpu.dot_dimension_numbers<[1], [0], [0], [1], [0, 0, 1, 1], [], []>} : vector<16x16xbf16>, vector<16x32xbf16>, vector<16x32xf32> -> vector<16x32xf32>
    %53 = arith.truncf %52 : vector<16x32xf32> to vector<16x32xbf16>
    %c1_42 = arith.constant 1 : index
    %c1_43 = arith.constant 1 : index
    %c0_44 = arith.constant 0 : index
    %c0_45 = arith.constant 0 : index
    %54 = vector.load %arg4[%c1_42, %c1_43, %c0_44, %c0_45] : memref<2x5x32x32xbf16, #tpu.memory_space<vmem>>, vector<1x1x32x32xbf16>
    %55 = vector.shape_cast %54 : vector<1x1x32x32xbf16> to vector<32x32xbf16>
    %cst_46 = arith.constant dense<0.000000e+00> : vector<16x32xf32>
    %56 = tpu.matmul %53, %55, %cst_46 {dimension_numbers = #tpu.dot_dimension_numbers<[1], [0], [0], [1], [0, 0, 1, 1], [], []>} : vector<16x32xbf16>, vector<32x32xbf16>, vector<16x32xf32> -> vector<16x32xf32>
    %57 = arith.addf %50, %56 : vector<16x32xf32>
    %58 = arith.truncf %52 : vector<16x32xf32> to vector<16x32xbf16>
    %cst_47 = arith.constant dense<0.000000e+00> : vector<16x32xf32>
    %59 = tpu.matmul %0, %58, %cst_47 {dimension_numbers = #tpu.dot_dimension_numbers<[1], [0], [0], [1], [0, 0, 1, 1], [], []>} : vector<16x16xbf16>, vector<16x32xbf16>, vector<16x32xf32> -> vector<16x32xf32>
    %60 = arith.truncf %59 : vector<16x32xf32> to vector<16x32xbf16>
    %c1_48 = arith.constant 1 : index
    %c2_49 = arith.constant 2 : index
    %c0_50 = arith.constant 0 : index
    %c0_51 = arith.constant 0 : index
    %61 = vector.load %arg4[%c1_48, %c2_49, %c0_50, %c0_51] : memref<2x5x32x32xbf16, #tpu.memory_space<vmem>>, vector<1x1x32x32xbf16>
    %62 = vector.shape_cast %61 : vector<1x1x32x32xbf16> to vector<32x32xbf16>
    %cst_52 = arith.constant dense<0.000000e+00> : vector<16x32xf32>
    %63 = tpu.matmul %60, %62, %cst_52 {dimension_numbers = #tpu.dot_dimension_numbers<[1], [0], [0], [1], [0, 0, 1, 1], [], []>} : vector<16x32xbf16>, vector<32x32xbf16>, vector<16x32xf32> -> vector<16x32xf32>
    %64 = arith.addf %57, %63 : vector<16x32xf32>
    %65 = arith.truncf %59 : vector<16x32xf32> to vector<16x32xbf16>
    %cst_53 = arith.constant dense<0.000000e+00> : vector<16x32xf32>
    %66 = tpu.matmul %0, %65, %cst_53 {dimension_numbers = #tpu.dot_dimension_numbers<[1], [0], [0], [1], [0, 0, 1, 1], [], []>} : vector<16x16xbf16>, vector<16x32xbf16>, vector<16x32xf32> -> vector<16x32xf32>
    %67 = arith.truncf %66 : vector<16x32xf32> to vector<16x32xbf16>
    %c1_54 = arith.constant 1 : index
    %c3_55 = arith.constant 3 : index
    %c0_56 = arith.constant 0 : index
    %c0_57 = arith.constant 0 : index
    %68 = vector.load %arg4[%c1_54, %c3_55, %c0_56, %c0_57] : memref<2x5x32x32xbf16, #tpu.memory_space<vmem>>, vector<1x1x32x32xbf16>
    %69 = vector.shape_cast %68 : vector<1x1x32x32xbf16> to vector<32x32xbf16>
    %cst_58 = arith.constant dense<0.000000e+00> : vector<16x32xf32>
    %70 = tpu.matmul %67, %69, %cst_58 {dimension_numbers = #tpu.dot_dimension_numbers<[1], [0], [0], [1], [0, 0, 1, 1], [], []>} : vector<16x32xbf16>, vector<32x32xbf16>, vector<16x32xf32> -> vector<16x32xf32>
    %71 = arith.addf %64, %70 : vector<16x32xf32>
    %72 = arith.truncf %66 : vector<16x32xf32> to vector<16x32xbf16>
    %cst_59 = arith.constant dense<0.000000e+00> : vector<16x32xf32>
    %73 = tpu.matmul %0, %72, %cst_59 {dimension_numbers = #tpu.dot_dimension_numbers<[1], [0], [0], [1], [0, 0, 1, 1], [], []>} : vector<16x16xbf16>, vector<16x32xbf16>, vector<16x32xf32> -> vector<16x32xf32>
    %74 = arith.truncf %73 : vector<16x32xf32> to vector<16x32xbf16>
    %c1_60 = arith.constant 1 : index
    %c4_61 = arith.constant 4 : index
    %c0_62 = arith.constant 0 : index
    %c0_63 = arith.constant 0 : index
    %75 = vector.load %arg4[%c1_60, %c4_61, %c0_62, %c0_63] : memref<2x5x32x32xbf16, #tpu.memory_space<vmem>>, vector<1x1x32x32xbf16>
    %76 = vector.shape_cast %75 : vector<1x1x32x32xbf16> to vector<32x32xbf16>
    %cst_64 = arith.constant dense<0.000000e+00> : vector<16x32xf32>
    %77 = tpu.matmul %74, %76, %cst_64 {dimension_numbers = #tpu.dot_dimension_numbers<[1], [0], [0], [1], [0, 0, 1, 1], [], []>} : vector<16x32xbf16>, vector<32x32xbf16>, vector<16x32xf32> -> vector<16x32xf32>
    %78 = arith.addf %71, %77 : vector<16x32xf32>
    %c1_65 = arith.constant 1 : index
    %c0_66 = arith.constant 0 : index
    %79 = vector.load %arg5[%c1_65, %c0_66] : memref<2x32xf32, #tpu.memory_space<vmem>>, vector<1x32xf32>
    %80 = vector.broadcast %79 : vector<1x32xf32> to vector<16x32xf32>
    %81 = arith.addf %78, %80 : vector<16x32xf32>
    %cst_67 = arith.constant 0.000000e+00 : f32
    %82 = vector.broadcast %cst_67 : f32 to vector<16x32xf32>
    %83 = arith.cmpf oge, %81, %82 : vector<16x32xf32>
    %cst_68 = arith.constant 0.00999999977 : f32
    %84 = vector.broadcast %cst_68 : f32 to vector<16x32xf32>
    %85 = arith.mulf %84, %81 : vector<16x32xf32>
    %86 = arith.select %83, %81, %85 : vector<16x32xi1>, vector<16x32xf32>
    %87 = arith.truncf %86 : vector<16x32xf32> to vector<16x32xbf16>
    %c0_69 = arith.constant 0 : index
    %c0_70 = arith.constant 0 : index
    %88 = vector.load %arg6[%c0_69, %c0_70] : memref<32x128xbf16, #tpu.memory_space<vmem>>, vector<32x128xbf16>
    %cst_71 = arith.constant dense<0.000000e+00> : vector<16x128xf32>
    %89 = tpu.matmul %87, %88, %cst_71 {dimension_numbers = #tpu.dot_dimension_numbers<[1], [0], [0], [1], [0, 0, 1, 1], [], []>} : vector<16x32xbf16>, vector<32x128xbf16>, vector<16x128xf32> -> vector<16x128xf32>
    %c0_72 = arith.constant 0 : index
    %c0_73 = arith.constant 0 : index
    %90 = vector.load %arg7[%c0_72, %c0_73] : memref<1x128xf32, #tpu.memory_space<vmem>>, vector<1x128xf32>
    %91 = vector.broadcast %90 : vector<1x128xf32> to vector<16x128xf32>
    %92 = arith.addf %89, %91 : vector<16x128xf32>
    %93 = tpu.iota {dimensions = array<i32: 1>} : vector<16x128xi32>
    %c2_i32 = arith.constant 2 : i32
    %94 = vector.broadcast %c2_i32 : i32 to vector<16x128xi32>
    %95 = arith.cmpi slt, %93, %94 : vector<16x128xi32>
    %cst_74 = arith.constant 2.000000e+01 : f32
    %96 = vector.broadcast %cst_74 : f32 to vector<16x128xf32>
    %97 = arith.cmpf ogt, %92, %96 : vector<16x128xf32>
    %cst_75 = arith.constant 2.000000e+01 : f32
    %98 = vector.broadcast %cst_75 : f32 to vector<16x128xf32>
    %99 = arith.minimumf %92, %98 : vector<16x128xf32>
    %100 = math.exp %99 : vector<16x128xf32>
    %101 = math.log1p %100 : vector<16x128xf32>
    %102 = arith.select %97, %92, %101 : vector<16x128xi1>, vector<16x128xf32>
    %103 = arith.select %95, %92, %102 : vector<16x128xi1>, vector<16x128xf32>
    %c0_76 = arith.constant 0 : index
    %c0_77 = arith.constant 0 : index
    %104 = vector.load %arg8[%c0_76, %c0_77] : memref<16x128xf32, #tpu.memory_space<vmem>>, vector<16x128xf32>
    tpu.vector_store %arg8[%c0_76, %c0_77], %103 {strides = array<i32>} : memref<16x128xf32, #tpu.memory_space<vmem>>, vector<16x128xf32>,
    return
  }
}

</mosaic_0001>

<bundles_post_ra>
// kernel: tpu_custom_call.1
= control target key start
LH: loop header
LB: loop body
LE: loop exit
PB: predicated region body
PF: predicated region fallthrough
CT: control target
= control target key end

     0   :  { %13 = vsyncpa [#allocation3], 0  ;;  %s1761_s0 = inlined_call_operand.vmem [shape: bf16[16,4], index: 0, kind: input, shape index: {}]   ;;  %s1762_s1 = inlined_call_operand.vmem [shape: bf16[16,16], index: 1, kind: input, shape index: {}]   ;;  %s1763_s2 = inlined_call_operand.vmem [shape: bf16[4,32], index: 2, kind: input, shape index: {}]   ;;  %s1764_s3 = inlined_call_operand.vmem [shape: f32[1,32], index: 3, kind: input, shape index: {}]   ;;  %s1765_s4 = inlined_call_operand.hbm [shape: bf16[2,5,32,32], index: 4, kind: input, shape index: {}]   ;;  %s1766_s5 = inlined_call_operand.vmem [shape: f32[2,32], index: 5, kind: input, shape index: {}]   ;;  %s1767_s6 = inlined_call_operand.vmem [shape: bf16[32,128], index: 6, kind: input, shape index: {}]   ;;  %s1768_s7 = inlined_call_operand.vmem [shape: f32[1,128], index: 7, kind: input, shape index: {}]   ;;  %s1769_s8 = inlined_call_operand.hbm [shape: f32[16,128], index: 8, kind: output, shape index: {}]  }
   0x1   :  { %14 = vsyncpa [#allocation4], 0  ;;  %s1555_s27 = smov [#allocation2]   ;;  %s1507_s9 = scalar_lea.hbm %s1765_s4, 2560 }
   0x2   :  { %s28_s28 = sshll.u32 %s1555_s27, 4  ;;  %p1508_p0 = scmp.ne.s32.totalorder %s1765_s4, %s1507_s9  ;;  %s29_s28 = int_to_ptr.vmem [resolvable:$true] %s28_s28 }
   0x3   :  { %p1511_p1 = scmp.lt.u32.totalorder %s1507_s9, %s1765_s4 }
   0x5   :  { %p1513_p2 = pnand %p1511_p1, %p1508_p0 }
   0x7   :  { %1516 = shalt.err (!%p1513_p2)
}
   0x8   :  { %s1517_s14 = scalar_lea.vmem %s29_s28, 2560  ;;  %p1522_p4 = scmp.lt.s32.totalorder %s29_s28, %s29_s28 }
   0x9   :  { %p1518_p3 = scmp.ne.s32.totalorder %s29_s28, %s1517_s14  ;;  %p1523_p5 = scmp.lt.s32.totalorder %s1517_s14, %s1517_s14 }
   0xb   :  { %p1524_p6 = por %p1523_p5, %p1522_p4 }
   0xd   :  { %p1525_p7 = pnand %p1524_p6, %p1518_p3 }
   0xf   :  { %1528 = shalt.err (!%p1525_p7)
}
  0x10   :  { %s1556_s15 = smov 64   ;;  %s1557_s16 = smov 4  }
  0x11   :  { %34 = dma.hbm_to_vmem [thread:$0]  %s1765_s4, 2560, %s29_s28, [#allocation3], %s1556_s15, %s1556_s15, %s1557_s16  }
  0x12   :  { %1551 = dma.done.wait [#allocation3], 2560  }
  0x13   :  { %1552 = vsyncadd [#allocation3], 4294964736  ;;  %v1558_v0 = vmov 0.0   ;;  %vm1559_vm0 = vmmov 0   ;;  %vm66_vm1 = vcmask 1041408   ;;  %v1475_v3 = vld [vmem:[%s1761_s0] sm:$0xff]  }
  0x14   :  { %1325 = vmatprep.subr.bf16.mxu0 %v1558_v0  ;;  %1327 = vmatprep.mubr.msk.bf16.mxu0 %vm1559_vm0, %v1558_v0  ;;  %v49_v1 = vld [vmem:[%s1763_s2] sm:$0x3]  ;;  %vm62_vm2 = vcmask 31744   ;;  %v1479_v4 = vld [vmem:[#allocation2 + $0x10] sm:$0xff]   ;;  %vm121_vm3 = vcmask 130048   ;;  %v1477_v14 = vld [vmem:[#allocation2] sm:$0xff]  }
  0x15   :  { %1331 = vmatprep.subr.bf16.mxu1 %v1558_v0  ;;  %1333 = vmatprep.mubr.msk.bf16.mxu1 %vm1559_vm0, %v1558_v0  ;;  %v68_v2 = vsel %vm66_vm1, %v49_v1, 0  ;;  %v1226_v5 = vld [vmem:[%s1764_s3] ss:$0 sm:$0xff]  ;;  %vm184_vm4 = vcmask 261120   ;;  %v1480_v16 = vld [vmem:[#allocation2 + $0x18] sm:$0xff]   ;;  %v1481_v26 = vld [vmem:[#allocation2 + $0x20] sm:$0xff]  }
  0x16   :  { %1326 = vmatpush3.bf16.msra.mxu0 %v68_v2  ;;  %v1642_v13 = vld [vmem:[%s1762_s1] sm:$0xff]   ;;  %v1483_v39 = vld [vmem:[#allocation2 + $0x30] sm:$0xff]   ;;  %v1484_v40 = vld [vmem:[#allocation2 + $0x38] sm:$0xff]  }
  0x17   :  { %1337 = vmatprep.subr.bf16.mxu0 %v1558_v0  ;;  %v1478_v15 = vld [vmem:[#allocation2 + $0x8] sm:$0xff]   ;;  %v1485_v52 = vld [vmem:[#allocation2 + $0x40] sm:$0xff]  }
  0x18   :  { %v1482_v27 = vld [vmem:[#allocation2 + $0x28] sm:$0xff]   ;;  %v1489_v2 = vld [vmem:[#allocation2 + $0x60] sm:$0xff]  }
  0x19   :  { %1328 = vmatmul.mubr.msk.bf16.vlgmr.msra.gmra.mrb[0].mxu0 %vm62_vm2, %v1475_v3  ;;  %v1486_v53 = vld [vmem:[#allocation2 + $0x48] sm:$0xff]  }
  0x1a   :  { %1341 = vmatprep.mubr.msk.bf16.mxu0 %vm1559_vm0, %v1558_v0  ;;  %1338 = vmatpush3.bf16.msra.mxu0 %v1479_v4  ;;  %v1249_v4 = vld [vmem:[%s1766_s5] ss:$0 sm:$0xff] }
  0x1b   :  { %1339 = vmatprep.subr.bf16.mxu0 %v1558_v0 }
  0x1e   :  { %1340 = vmatpush3.bf16.msra.mxu0 %v1480_v16 }
  0x1f   :  { %1353 = vmatprep.subr.bf16.mxu0 %v1558_v0 }
  0xec   :  { %v104_v6 = vpop.f32.mrb[0].mxu0 }
  0xed   :  { %v1329_v7 = vpop.f32.mrb[1].mxu0  ;;  %v105_v9 = vadd.f32 %v1226_v5, %v104_v6 }
  0xee   :  { %v107_v8 = vpop.f32.mrb[2].mxu0 }
  0xef   :  { %v108_v10 = vadd.f32 %v1226_v5, %v107_v8  ;;  %v1330_v11 = vpop.f32.mrb[3].mxu0 }
  0xf1   :  { %v111_v12 = vpack.c.bf16 %v108_v10, %v105_v9 }
  0xf3   :  { %1332 = vmatpush3.bf16.msra.mxu1 %v111_v12 }
  0xf4   :  { %1345 = vmatprep.subr.bf16.mxu1 %v1558_v0 }
  0xf6   :  { %1334 = vmatmul.mubr.msk.bf16.vlgmr.msra.gmra.mrb[0].mxu1 %vm121_vm3, %v1642_v13 }
  0xf7   :  { %1346 = vmatpush3.bf16.msra.mxu1 %v1477_v14  ;;  %1349 = vmatprep.mubr.msk.bf16.mxu1 %vm1559_vm0, %v1558_v0 }
  0xf8   :  { %1347 = vmatprep.subr.bf16.mxu1 %v1558_v0 }
  0xfb   :  { %1348 = vmatpush3.bf16.msra.mxu1 %v1478_v15 }
  0xfc   :  { %1359 = vmatprep.subr.bf16.mxu1 %v1558_v0 }
  0xfe   :  { %1350 = vmatmul.mubr.msk.bf16.vlgmr.msra.gmra.mrb[4].mxu1 %vm184_vm4, %v111_v12 }
  0xff   :  { %1363 = vmatprep.mubr.msk.bf16.mxu1 %vm1559_vm0, %v1558_v0  ;;  %1360 = vmatpush3.bf16.msra.mxu1 %v1481_v26 }
 0x100   :  { %1361 = vmatprep.subr.bf16.mxu1 %v1558_v0 }
 0x103   :  { %1362 = vmatpush3.bf16.msra.mxu1 %v1482_v27 }
 0x104   :  { %1373 = vmatprep.subr.bf16.mxu1 %v1558_v0 }
 0x1c9   :  { %v159_v17 = vpop.f32.mrb[0].mxu1 }
 0x1ca   :  { %v1335_v18 = vpop.f32.mrb[1].mxu1 }
 0x1cb   :  { %v162_v19 = vpop.f32.mrb[2].mxu1  ;;  %v1487_v18 = vld [vmem:[#allocation2 + $0x50] sm:$0xff]  }
 0x1cc   :  { %v166_v20 = vpack.c.bf16 %v162_v19, %v159_v17  ;;  %v1336_v21 = vpop.f32.mrb[3].mxu1  ;;  %v1488_v19 = vld [vmem:[#allocation2 + $0x58] sm:$0xff]  }
 0x1ce   :  { %1342 = vmatmul.mubr.msk.bf16.vlgmr.msra.gmra.mrb[4].mxu0 %vm184_vm4, %v166_v20 }
 0x1cf   :  { %1354 = vmatpush3.bf16.msra.mxu0 %v166_v20  ;;  %1355 = vmatprep.mubr.msk.bf16.mxu0 %vm1559_vm0, %v1558_v0  ;;  %v1490_v20 = vld [vmem:[#allocation2 + $0x68] sm:$0xff]  }
 0x1d0   :  { %1367 = vmatprep.subr.bf16.mxu0 %v1558_v0 }
 0x1d1   :  { %v278_v22 = vpop.f32.mrb[4].mxu1 }
 0x1d2   :  { %v1351_v23 = vpop.f32.mrb[5].mxu1 }
 0x1d3   :  { %v281_v24 = vpop.f32.mrb[6].mxu1 }
 0x1d4   :  { %v1352_v25 = vpop.f32.mrb[7].mxu1 }
 0x1d6   :  { %1356 = vmatmul.mubr.msk.bf16.vlgmr.msra.gmra.mrb[8].mxu0 %vm121_vm3, %v1642_v13 }
 0x1d7   :  { %1369 = vmatprep.mubr.msk.bf16.mxu0 %vm1559_vm0, %v1558_v0 }
 0x2a1   :  { %v222_v28 = vpop.f32.mrb[4].mxu0 }
 0x2a2   :  { %v279_v29 = vadd.f32 %v278_v22, %v222_v28  ;;  %v1343_v30 = vpop.f32.mrb[5].mxu0 }
 0x2a3   :  { %v225_v31 = vpop.f32.mrb[6].mxu0  ;;  %v1491_v30 = vld [vmem:[#allocation2 + $0x70] sm:$0xff]  }
 0x2a4   :  { %v282_v32 = vadd.f32 %v281_v24, %v225_v31  ;;  %v1344_v33 = vpop.f32.mrb[7].mxu0  ;;  %v1492_v31 = vld [vmem:[#allocation2 + $0x78] sm:$0xff]  }
 0x2a9   :  { %v319_v34 = vpop.f32.mrb[8].mxu0 }
 0x2aa   :  { %v1357_v35 = vpop.f32.mrb[9].mxu0 }
 0x2ab   :  { %v322_v36 = vpop.f32.mrb[10].mxu0 }
 0x2ac   :  { %v326_v37 = vpack.c.bf16 %v322_v36, %v319_v34  ;;  %v1358_v38 = vpop.f32.mrb[11].mxu0 }
 0x2ae   :  { %1364 = vmatmul.mubr.msk.bf16.vlgmr.msra.gmra.mrb[8].mxu1 %vm184_vm4, %v326_v37  ;;  %1368 = vmatpush3.bf16.msra.mxu0 %v326_v37 }
 0x2af   :  { %1377 = vmatprep.mubr.msk.bf16.mxu1 %vm1559_vm0, %v1558_v0  ;;  %1381 = vmatprep.subr.bf16.mxu0 %v1558_v0 }
 0x2b0   :  { %1374 = vmatpush3.bf16.msra.mxu1 %v1483_v39 }
 0x2b1   :  { %1370 = vmatmul.mubr.msk.bf16.vlgmr.msra.gmra.mrb[12].mxu0 %vm121_vm3, %v1642_v13  ;;  %1375 = vmatprep.subr.bf16.mxu1 %v1558_v0 }
 0x2b2   :  { %1383 = vmatprep.mubr.msk.bf16.mxu0 %vm1559_vm0, %v1558_v0 }
 0x2b4   :  { %1376 = vmatpush3.bf16.msra.mxu1 %v1484_v40 }
 0x2b5   :  { %1387 = vmatprep.subr.bf16.mxu1 %v1558_v0 }
 0x381   :  { %v381_v41 = vpop.f32.mrb[8].mxu1 }
 0x382   :  { %v388_v42 = vadd.f32 %v381_v41, %v279_v29  ;;  %v1365_v43 = vpop.f32.mrb[9].mxu1 }
 0x383   :  { %v384_v44 = vpop.f32.mrb[10].mxu1  ;;  %v1493_v43 = vld [vmem:[#allocation2 + $0x80] sm:$0xff]  }
 0x384   :  { %v389_v45 = vadd.f32 %v384_v44, %v282_v32  ;;  %v1366_v46 = vpop.f32.mrb[11].mxu1  ;;  %v424_v47 = vpop.f32.mrb[12].mxu0  ;;  %v1494_v44 = vld [vmem:[#allocation2 + $0x88] sm:$0xff]  }
 0x385   :  { %v1371_v48 = vpop.f32.mrb[13].mxu0 }
 0x386   :  { %v427_v49 = vpop.f32.mrb[14].mxu0 }
 0x387   :  { %v431_v50 = vpack.c.bf16 %v427_v49, %v424_v47  ;;  %v1372_v51 = vpop.f32.mrb[15].mxu0 }
 0x389   :  { %1378 = vmatmul.mubr.msk.bf16.vlgmr.msra.gmra.mrb[12].mxu1 %vm184_vm4, %v431_v50  ;;  %1382 = vmatpush3.bf16.msra.mxu0 %v431_v50 }
 0x38a   :  { %1391 = vmatprep.mubr.msk.bf16.mxu1 %vm1559_vm0, %v1558_v0  ;;  %1395 = vmatprep.subr.bf16.mxu0 %v1558_v0 }
 0x38b   :  { %1388 = vmatpush3.bf16.msra.mxu1 %v1485_v52 }
 0x38c   :  { %1384 = vmatmul.mubr.msk.bf16.vlgmr.msra.gmra.mrb[16].mxu0 %vm121_vm3, %v1642_v13  ;;  %1389 = vmatprep.subr.bf16.mxu1 %v1558_v0 }
 0x38d   :  { %1397 = vmatprep.mubr.msk.bf16.mxu0 %vm1559_vm0, %v1558_v0 }
 0x38f   :  { %1390 = vmatpush3.bf16.msra.mxu1 %v1486_v53 }
 0x390   :  { %1401 = vmatprep.subr.bf16.mxu1 %v1558_v0 }
 0x45c   :  { %v486_v54 = vpop.f32.mrb[12].mxu1 }
 0x45d   :  { %v493_v55 = vadd.f32 %v486_v54, %v388_v42  ;;  %v1379_v56 = vpop.f32.mrb[13].mxu1 }
 0x45e   :  { %v489_v57 = vpop.f32.mrb[14].mxu1  ;;  %v1495_v56 = vld [vmem:[#allocation2 + $0x90] sm:$0xff]  }
 0x45f   :  { %v494_v58 = vadd.f32 %v489_v57, %v389_v45  ;;  %v1380_v59 = vpop.f32.mrb[15].mxu1  ;;  %v529_v60 = vpop.f32.mrb[16].mxu0  ;;  %v1496_v57 = vld [vmem:[#allocation2 + $0x98] sm:$0xff]  }
 0x460   :  { %v1385_v61 = vpop.f32.mrb[17].mxu0 }
 0x461   :  { %v532_v62 = vpop.f32.mrb[18].mxu0 }
 0x462   :  { %v536_v63 = vpack.c.bf16 %v532_v62, %v529_v60  ;;  %v1386_v1 = vpop.f32.mrb[19].mxu0 }
 0x464   :  { %1392 = vmatmul.mubr.msk.bf16.vlgmr.msra.gmra.mrb[16].mxu1 %vm184_vm4, %v536_v63 }
 0x465   :  { %1405 = vmatprep.mubr.msk.bf16.mxu1 %vm1559_vm0, %v1558_v0  ;;  %1402 = vmatpush3.bf16.msra.mxu1 %v1489_v2 }
 0x466   :  { %1403 = vmatprep.subr.bf16.mxu1 %v1558_v0 }
 0x469   :  { %1404 = vmatpush3.bf16.msra.mxu1 %v1490_v20 }
 0x46a   :  { %1417 = vmatprep.subr.bf16.mxu1 %v1558_v0 }
 0x537   :  { %v591_v3 = vpop.f32.mrb[16].mxu1 }
 0x538   :  { %v598_v5 = vadd.f32 %v591_v3, %v493_v55  ;;  %v1393_v6 = vpop.f32.mrb[17].mxu1 }
 0x539   :  { %v594_v7 = vpop.f32.mrb[18].mxu1  ;;  %v1498_v6 = vld [vmem:[%s1767_s6 + $0x8] sm:$0xff]  }
 0x53a   :  { %v605_v8 = vadd.f32 %v1249_v4, %v598_v5  ;;  %v599_v9 = vadd.f32 %v594_v7, %v494_v58  ;;  %v1394_v10 = vpop.f32.mrb[19].mxu1  ;;  %v1497_v5 = vld [vmem:[%s1767_s6] sm:$0xff]  }
 0x53c   :  { %v609_v11 = vmul.f32 0.01, %v605_v8  ;;  %v606_v12 = vadd.f32 %v1249_v4, %v599_v9  ;;  %vm607_vm5 = vcmp.ge.f32.partialorder %v605_v8, 0.0 }
 0x53e   :  { %vm608_vm6 = vcmp.ge.f32.partialorder %v606_v12, 0.0  ;;  %v610_v14 = vmul.f32 0.01, %v606_v12  ;;  %v611_v15 = vsel %vm607_vm5, %v605_v8, %v609_v11  ;;  %v1269_v8 = vld [vmem:[%s1766_s5 + $0x1] ss:$0 sm:$0xff]  ;;  %s1560_s5 = smov [#allocation5]  }
 0x540   :  { %v612_v16 = vsel %vm608_vm6, %v606_v12, %v610_v14 }
 0x541   :  { %v613_v17 = vpack.c.bf16 %v612_v16, %v611_v15 }
 0x543   :  { %1396 = vmatpush3.bf16.msra.mxu0 %v613_v17 }
 0x544   :  { %1409 = vmatprep.subr.bf16.mxu0 %v1558_v0 }
 0x546   :  { %1398 = vmatmul.mubr.msk.bf16.vlgmr.msra.gmra.mrb[20].mxu0 %vm121_vm3, %v1642_v13 }
 0x547   :  { %1410 = vmatpush3.bf16.msra.mxu0 %v1487_v18  ;;  %1413 = vmatprep.mubr.msk.bf16.mxu0 %vm1559_vm0, %v1558_v0 }
 0x548   :  { %1411 = vmatprep.subr.bf16.mxu0 %v1558_v0 }
 0x54b   :  { %1412 = vmatpush3.bf16.msra.mxu0 %v1488_v19 }
 0x54c   :  { %1423 = vmatprep.subr.bf16.mxu0 %v1558_v0 }
 0x54e   :  { %1414 = vmatmul.mubr.msk.bf16.vlgmr.msra.gmra.mrb[24].mxu0 %vm184_vm4, %v613_v17 }
 0x54f   :  { %1427 = vmatprep.mubr.msk.bf16.mxu0 %vm1559_vm0, %v1558_v0  ;;  %1424 = vmatpush3.bf16.msra.mxu0 %v1491_v30 }
 0x550   :  { %1425 = vmatprep.subr.bf16.mxu0 %v1558_v0 }
 0x553   :  { %1426 = vmatpush3.bf16.msra.mxu0 %v1492_v31 }
 0x554   :  { %1437 = vmatprep.subr.bf16.mxu0 %v1558_v0 }
 0x619   :  { %v653_v21 = vpop.f32.mrb[20].mxu0 }
 0x61a   :  { %v1399_v22 = vpop.f32.mrb[21].mxu0 }
 0x61b   :  { %v656_v23 = vpop.f32.mrb[22].mxu0 }
 0x61c   :  { %v660_v24 = vpack.c.bf16 %v656_v23, %v653_v21  ;;  %v1400_v25 = vpop.f32.mrb[23].mxu0  ;;  %v1270_v21 = vld [vmem:[%s1768_s7] ss:$0 sm:$0xff]  ;;  %s1214_s7 = sshll.u32 %s1560_s5, 4  ;;  %s1215_s7 = int_to_ptr.vmem [resolvable:$true] %s1214_s7 }
 0x61d   :  { %s1529_s9 = scalar_lea.vmem %s1215_s7, 256  ;;  %p1534_p9 = scmp.lt.s32.totalorder %s1215_s7, %s1215_s7 }
 0x61e   :  { %1406 = vmatmul.mubr.msk.bf16.vlgmr.msra.gmra.mrb[20].mxu1 %vm184_vm4, %v660_v24  ;;  %p1530_p8 = scmp.ne.s32.totalorder %s1215_s7, %s1529_s9  ;;  %p1535_p10 = scmp.lt.s32.totalorder %s1529_s9, %s1529_s9 }
 0x61f   :  { %1418 = vmatpush3.bf16.msra.mxu1 %v660_v24  ;;  %1419 = vmatprep.mubr.msk.bf16.mxu1 %vm1559_vm0, %v1558_v0 }
 0x620   :  { %1431 = vmatprep.subr.bf16.mxu1 %v1558_v0  ;;  %p1536_p11 = por %p1535_p10, %p1534_p9 }
 0x621   :  { %v771_v26 = vpop.f32.mrb[24].mxu0 }
 0x622   :  { %v1415_v27 = vpop.f32.mrb[25].mxu0  ;;  %p1537_p12 = pnand %p1536_p11, %p1530_p8 }
 0x623   :  { %v774_v28 = vpop.f32.mrb[26].mxu0 }
 0x624   :  { %v1416_v29 = vpop.f32.mrb[27].mxu0 }
 0x626   :  { %1420 = vmatmul.mubr.msk.bf16.vlgmr.msra.gmra.mrb[24].mxu1 %vm121_vm3, %v1642_v13 }
 0x627   :  { %1433 = vmatprep.mubr.msk.bf16.mxu1 %vm1559_vm0, %v1558_v0 }
 0x6f1   :  { %v715_v32 = vpop.f32.mrb[20].mxu1 }
 0x6f2   :  { %v772_v33 = vadd.f32 %v771_v26, %v715_v32  ;;  %v1407_v34 = vpop.f32.mrb[21].mxu1 }
 0x6f3   :  { %v718_v35 = vpop.f32.mrb[22].mxu1 }
 0x6f4   :  { %v775_v36 = vadd.f32 %v774_v28, %v718_v35  ;;  %v1408_v37 = vpop.f32.mrb[23].mxu1 }
 0x6f5   :  { %v1174_v37 = vlaneseq }
 0x6f9   :  { %v812_v38 = vpop.f32.mrb[24].mxu1 }
 0x6fa   :  { %v1421_v39 = vpop.f32.mrb[25].mxu1 }
 0x6fb   :  { %v815_v40 = vpop.f32.mrb[26].mxu1 }
 0x6fc   :  { %v819_v41 = vpack.c.bf16 %v815_v40, %v812_v38  ;;  %v1422_v42 = vpop.f32.mrb[27].mxu1  ;;  %v1175_v40 = vand.u32 127, %v1174_v37 }
 0x6fe   :  { %1428 = vmatmul.mubr.msk.bf16.vlgmr.msra.gmra.mrb[28].mxu0 %vm184_vm4, %v819_v41  ;;  %1432 = vmatpush3.bf16.msra.mxu1 %v819_v41  ;;  %vm1176_vm9 = vcmp.lt.s32.totalorder %v1175_v40, 2 }
 0x6ff   :  { %1441 = vmatprep.mubr.msk.bf16.mxu0 %vm1559_vm0, %v1558_v0  ;;  %1445 = vmatprep.subr.bf16.mxu1 %v1558_v0 }
 0x700   :  { %1438 = vmatpush3.bf16.msra.mxu0 %v1493_v43 }
 0x701   :  { %1434 = vmatmul.mubr.msk.bf16.vlgmr.msra.gmra.mrb[28].mxu1 %vm121_vm3, %v1642_v13  ;;  %1439 = vmatprep.subr.bf16.mxu0 %v1558_v0 }
 0x702   :  { %1447 = vmatprep.mubr.msk.bf16.mxu1 %vm1559_vm0, %v1558_v0 }
 0x704   :  { %1440 = vmatpush3.bf16.msra.mxu0 %v1494_v44 }
 0x705   :  { %1451 = vmatprep.subr.bf16.mxu0 %v1558_v0 }
 0x7d1   :  { %v874_v45 = vpop.f32.mrb[28].mxu0 }
 0x7d2   :  { %v881_v46 = vadd.f32 %v874_v45, %v772_v33  ;;  %v1429_v47 = vpop.f32.mrb[29].mxu0 }
 0x7d3   :  { %v877_v48 = vpop.f32.mrb[30].mxu0 }
 0x7d4   :  { %v882_v49 = vadd.f32 %v877_v48, %v775_v36  ;;  %v1430_v50 = vpop.f32.mrb[31].mxu0  ;;  %v917_v51 = vpop.f32.mrb[28].mxu1 }
 0x7d5   :  { %v1435_v52 = vpop.f32.mrb[29].mxu1 }
 0x7d6   :  { %v920_v53 = vpop.f32.mrb[30].mxu1 }
 0x7d7   :  { %v924_v54 = vpack.c.bf16 %v920_v53, %v917_v51  ;;  %v1436_v55 = vpop.f32.mrb[31].mxu1 }
 0x7d9   :  { %1442 = vmatmul.mubr.msk.bf16.vlgmr.msra.gmra.mrb[32].mxu0 %vm184_vm4, %v924_v54  ;;  %1446 = vmatpush3.bf16.msra.mxu1 %v924_v54 }
 0x7da   :  { %1455 = vmatprep.mubr.msk.bf16.mxu0 %vm1559_vm0, %v1558_v0  ;;  %1459 = vmatprep.subr.bf16.mxu1 %v1558_v0 }
 0x7db   :  { %1452 = vmatpush3.bf16.msra.mxu0 %v1495_v56 }
 0x7dc   :  { %1448 = vmatmul.mubr.msk.bf16.vlgmr.msra.gmra.mrb[32].mxu1 %vm121_vm3, %v1642_v13  ;;  %1453 = vmatprep.subr.bf16.mxu0 %v1558_v0 }
 0x7dd   :  { %1463 = vmatprep.mubr.msk.bf16.mxu1 %vm1559_vm0, %v1558_v0  ;;  %1460 = vmatpush3.bf16.msra.mxu1 %v1497_v5 }
 0x7de   :  { %1461 = vmatprep.subr.bf16.mxu1 %v1558_v0 }
 0x7df   :  { %1454 = vmatpush3.bf16.msra.mxu0 %v1496_v57 }
 0x7e1   :  { %1462 = vmatpush3.bf16.msra.mxu1 %v1498_v6 }
 0x8ac   :  { %v979_v58 = vpop.f32.mrb[32].mxu0 }
 0x8ad   :  { %v986_v59 = vadd.f32 %v979_v58, %v881_v46  ;;  %v1443_v60 = vpop.f32.mrb[33].mxu0 }
 0x8ae   :  { %v982_v61 = vpop.f32.mrb[34].mxu0 }
 0x8af   :  { %v987_v62 = vadd.f32 %v982_v61, %v882_v49  ;;  %v1444_v63 = vpop.f32.mrb[35].mxu0  ;;  %v1022_v1 = vpop.f32.mrb[32].mxu1 }
 0x8b0   :  { %v1449_v2 = vpop.f32.mrb[33].mxu1 }
 0x8b1   :  { %v1025_v3 = vpop.f32.mrb[34].mxu1 }
 0x8b2   :  { %v1029_v4 = vpack.c.bf16 %v1025_v3, %v1022_v1  ;;  %v1450_v13 = vpop.f32.mrb[35].mxu1 }
 0x8b4   :  { %1456 = vmatmul.mubr.msk.bf16.vlgmr.msra.gmra.mrb[36].mxu0 %vm184_vm4, %v1029_v4 }
 0x987   :  { %v1084_v7 = vpop.f32.mrb[36].mxu0 }
 0x988   :  { %v1091_v9 = vadd.f32 %v1084_v7, %v986_v59  ;;  %v1457_v10 = vpop.f32.mrb[37].mxu0 }
 0x989   :  { %v1087_v11 = vpop.f32.mrb[38].mxu0 }
 0x98a   :  { %v1098_v12 = vadd.f32 %v1269_v8, %v1091_v9  ;;  %v1092_v14 = vadd.f32 %v1087_v11, %v987_v62  ;;  %v1458_v15 = vpop.f32.mrb[39].mxu0 }
 0x98c   :  { %v1102_v16 = vmul.f32 0.01, %v1098_v12  ;;  %v1099_v17 = vadd.f32 %v1269_v8, %v1092_v14  ;;  %vm1100_vm7 = vcmp.ge.f32.partialorder %v1098_v12, 0.0 }
 0x98e   :  { %vm1101_vm8 = vcmp.ge.f32.partialorder %v1099_v17, 0.0  ;;  %v1103_v0 = vmul.f32 0.01, %v1099_v17  ;;  %v1104_v18 = vsel %vm1100_vm7, %v1098_v12, %v1102_v16 }
 0x990   :  { %v1105_v19 = vsel %vm1101_vm8, %v1099_v17, %v1103_v0 }
 0x991   :  { %v1106_v20 = vpack.c.bf16 %v1105_v19, %v1104_v18 }
 0x993   :  { %1464 = vmatmul.mubr.msk.bf16.vlgmr.msra.gmra.mrb[36].mxu1 %vm184_vm4, %v1106_v20 }
 0xa66   :  { %v1167_v22 = vpop.f32.mrb[36].mxu1 }
 0xa67   :  { %v1168_v23 = vadd.f32 %v1270_v21, %v1167_v22  ;;  %v1465_v24 = vpop.f32.mrb[37].mxu1 }
 0xa68   :  { %v1170_v25 = vpop.f32.mrb[38].mxu1 }
 0xa69   :  { %v1179_v26 = vmin.f32 %v1168_v23, 20.0  ;;  %v1171_v27 = vadd.f32 %v1270_v21, %v1170_v25  ;;  %v1466_v28 = vpop.f32.mrb[39].mxu1  ;;  %vm1177_vm11 = vcmp.gt.f32.partialorder %v1168_v23, 20.0 }
 0xa6b   :  { %v1181_v29 = vmul.f32 1.442695, %v1179_v26  ;;  %v1180_v30 = vmin.f32 %v1171_v27, 20.0  ;;  %vm1178_vm13 = vcmp.gt.f32.partialorder %v1171_v27, 20.0 }
 0xa6d   :  { %1499 = vpow2.f32 %v1181_v29  ;;  %v1183_v31 = vmul.f32 1.442695, %v1180_v30 }
 0xa6f   :  { %1501 = vpow2.f32 %v1183_v31 }
 0xa77   :  { %v1500_v32 = vpop.eup %1499 }
 0xa78   :  { %v1185_v33 = vadd.f32 1.0, %v1500_v32  ;;  %v1188_v36 = vmul.f32 -0.5, %v1500_v32  ;;  %v1191_v41 = vand.u32 2147483647, %v1500_v32 }
 0xa79   :  { %v1502_v34 = vpop.eup %1501 }
 0xa7a   :  { %1503 = vlog2.f32 %v1185_v33  ;;  %v1194_v35 = vadd.f32 1.0, %v1502_v34  ;;  %v1197_v38 = vmul.f32 -0.5, %v1502_v34  ;;  %v1189_v39 = vadd.f32 1.0, %v1188_v36 }
 0xa7b   :  { %v1200_v44 = vand.u32 2147483647, %v1502_v34  ;;  %vm1192_vm10 = vcmp.lt.f32.partialorder %v1191_v41, 0.0004427343 }
 0xa7c   :  { %1505 = vlog2.f32 %v1194_v35  ;;  %v1198_v42 = vadd.f32 1.0, %v1197_v38  ;;  %v1190_v46 = vmul.f32 %v1500_v32, %v1189_v39 }
 0xa7d   :  { %vm1201_vm12 = vcmp.lt.f32.partialorder %v1200_v44, 0.0004427343 }
 0xa7e   :  { %v1199_v50 = vmul.f32 %v1502_v34, %v1198_v42 }
 0xa84   :  { %v1504_v43 = vpop.eup %1503 }
 0xa85   :  { %v1187_v45 = vmul.f32 0.6931472, %v1504_v43 }
 0xa86   :  { %v1506_v47 = vpop.eup %1505 }
 0xa87   :  { %v1193_v48 = vsel %vm1192_vm10, %v1190_v46, %v1187_v45  ;;  %v1196_v49 = vmul.f32 0.6931472, %v1506_v47 }
 0xa88   :  { %v1203_v51 = vsel %vm1177_vm11, %v1168_v23, %v1193_v48 }
 0xa89   :  { %v1205_v52 = vsel %vm1176_vm9, %v1168_v23, %v1203_v51  ;;  %v1202_v53 = vsel %vm1201_vm12, %v1199_v50, %v1196_v49 }
 0xa8a   :  { %1207 = vst [vmem:[#allocation5] sm:$0xff] %v1205_v52  ;;  %v1204_v54 = vsel %vm1178_vm13, %v1171_v27, %v1202_v53 }
 0xa8b   :  { %v1206_v55 = vsel %vm1176_vm9, %v1171_v27, %v1204_v54 }
 0xa8c   :  { %1208 = vst [vmem:[#allocation5 + $0x8] sm:$0xff] %v1206_v55 }
 0xa8d   :  { %1540 = shalt.err (!%p1537_p12)
}
 0xa8e   :  { %s1541_s12 = scalar_lea.hbm %s1769_s8, 256 }
 0xa8f   :  { %p1542_p13 = scmp.ne.s32.totalorder %s1769_s8, %s1541_s12  ;;  %p1545_p0 = scmp.lt.u32.totalorder %s1541_s12, %s1769_s8 }
 0xa91   :  { %p1547_p1 = pnand %p1545_p0, %p1542_p13 }
 0xa93   :  { %1550 = shalt.err (!%p1547_p1)
}
 0xa94   :  { %s1561_s17 = smov 128   ;;  %s1562_s18 = smov 8  }
 0xa95   :  { %1220 = dma.vmem_to_hbm [thread:$0]  %s1215_s7, 256, %s1769_s8, [#allocation4], %s1561_s17, %s1561_s17, %s1562_s18  }
 0xa96   :  { %1553 = dma.done.wait [#allocation4], 256  }
 0xa97   :  { %1554 = vsyncadd [#allocation4], 4294967040 }
 0xa98   :  { %1224 = vsyncpa [#allocation3], 1 }
 0xa99   :  { %1225 = vsyncpa [#allocation4], 1 }

</bundles_post_ra>
